<compile_context>
chip_gen: v7x
topology: tpu7x:2x2x1
jax: 0.10.0
libtpu: 0.0.40
codegen_flags: <defaults>
</compile_context>

<pallas_src>
import functools

import jax
import jax.numpy as jnp
from jax.experimental import pallas as pl
from jax.experimental.pallas import tpu as pltpu

_LANES = 128
_SUBLANES = 8


def _default_num_partitions():
    """Best-effort TensorCore count (v7x: 2, v5e/v6e: 1); safe fallback = 2."""
    try:
        info = pltpu.get_tpu_info()
        for attr in ("num_cores", "num_tensorcores", "tensorcore_count"):
            v = getattr(info, attr, None)
            if isinstance(v, int) and v > 0:
                return max(1, min(v, 4))
    except Exception:
        pass
    return 2


def _bls_kernel(x_ref, t_ref, o_ref, *, smoothing, tile_rows, acc_rows,
                blocks_per_part, num_blocks, mask_threshold, last_block_valid):
    p = pl.program_id(0)          # partition axis ("parallel", megacore)
    k = pl.program_id(1)          # reduction axis ("arbitrary")

    @pl.when(k == 0)
    def _():
        o_ref[...] = jnp.zeros_like(o_ref)

    # Stream inputs in native dtype; upcast in-register (halves HBM traffic
    # for bf16 inputs).
    x = x_ref[...].astype(jnp.float32)
    t = t_ref[...].astype(jnp.float32)

    # Label "smoothing" exactly as in the PyTorch module: w = (1 - 2m) * t
    w = (1.0 - 2.0 * smoothing) * t

    # Numerically stable BCE-with-logits (== F.binary_cross_entropy_with_logits):
    #   max(x, 0) - x*w + log(1 + exp(-|x|))
    per_elem = jnp.maximum(x, 0.0) - x * w + jnp.log1p(jnp.exp(-jnp.abs(x)))

    def accumulate(vals):
        # (tile_rows,128) -> (tile_rows/acc_rows, acc_rows, 128) leading-dim
        # split (layout preserving); acc_rows=32 gives 4 independent f32 add
        # chains into the resident 4-vreg output block.
        o_ref[...] += vals.reshape(-1, acc_rows, _LANES).sum(axis=0)

    if mask_threshold is None:
        # Every block is full and valid: single unmasked fast path.
        accumulate(per_elem)
    else:
        blk = p * blocks_per_part + k

        @pl.when(blk < mask_threshold)
        def _():
            # Interior blocks: no mask arithmetic at all.
            accumulate(per_elem)

        @pl.when(blk >= mask_threshold)
        def _():
            # Last (ragged) block and clamped duplicate blocks only.
            # Block-local indices + per-block valid count -> no global flat
            # index, so no int32 overflow even for >2^31-element inputs.
            row = jax.lax.broadcasted_iota(jnp.int32, (tile_rows, _LANES), 0)
            lane = jax.lax.broadcasted_iota(jnp.int32, (tile_rows, _LANES), 1)
            local = row * _LANES + lane
            valid = jnp.where(blk >= num_blocks, 0, jnp.int32(last_block_valid))
            accumulate(jnp.where(local < valid, per_elem, 0.0))


def binary_label_smooth_loss(x, target, smoothing=0.0, tile_rows=4096,
                             num_partitions=None):
    """Pallas implementation of BinaryLabelSmoothLoss(smoothing, 'logit')."""
    assert x.shape == target.shape
    n_total = x.size
    assert n_total > 0

    flat_x = x.reshape(-1)          # native dtype; no wrapper-side upcast
    flat_t = target.reshape(-1)

    # Lane-dense 2D view.  If the element count is already a multiple of 128
    # this is a pure (copy-free) reshape; otherwise pad only <=127 elements.
    # TODO(synk): the <=127-element jnp.pad on non-128-aligned sizes still
    # copies both inputs once; a plain-JAX tail would avoid it entirely.
    rem = n_total % _LANES
    if rem:
        pad = _LANES - rem
        flat_x = jnp.pad(flat_x, (0, pad))
        flat_t = jnp.pad(flat_t, (0, pad))
    rows = flat_x.size // _LANES
    x2 = flat_x.reshape(rows, _LANES)
    t2 = flat_t.reshape(rows, _LANES)

    # Tile sizing: multiples of 32 rows (covers bf16/int8 sublane packing and
    # enables the 32-sublane accumulator); clamp to the data size.
    if rows >= 32:
        tile_rows = max(32, (min(int(tile_rows), rows) // 32) * 32)
        acc_rows = 32
    else:
        tile_rows = _SUBLANES * pl.cdiv(rows, _SUBLANES)
        acc_rows = _SUBLANES

    num_blocks = pl.cdiv(rows, tile_rows)
    if num_partitions is None:
        num_partitions = _default_num_partitions()
    num_partitions = max(1, min(int(num_partitions), num_blocks))
    blocks_per_part = pl.cdiv(num_blocks, num_partitions)

    # Static (trace-time) masking plan: only the last real block (if ragged)
    # and clamped duplicate blocks ever need masking.
    block_elems = tile_rows * _LANES
    last_block_valid = n_total - (num_blocks - 1) * block_elems  # Python int
    has_clamped = blocks_per_part * num_partitions > num_blocks
    if last_block_valid < block_elems:
        mask_threshold = num_blocks - 1
    elif has_clamped:
        mask_threshold = num_blocks
    else:
        mask_threshold = None      # no mask branch generated at all

    kernel = functools.partial(
        _bls_kernel,
        smoothing=float(smoothing),
        tile_rows=tile_rows,
        acc_rows=acc_rows,
        blocks_per_part=blocks_per_part,
        num_blocks=num_blocks,
        mask_threshold=mask_threshold,
        last_block_valid=last_block_valid,
    )

    def in_map(p, k):
        # Clamp to stay inside the array; clamped (duplicate) blocks are fully
        # masked inside the kernel, so they contribute nothing.
        return (jnp.minimum(p * blocks_per_part + k, num_blocks - 1), 0)

    out_rows = num_partitions * acc_rows
    out_bytes = out_rows * _LANES * 4

    # Only raise the scoped-VMEM limit when the chosen tiling actually needs
    # more than the conservative per-chip defaults (v5e 16 MiB).
    vmem_need = 2 * block_elems * (x.dtype.itemsize + target.dtype.itemsize) \
        + 2 * out_bytes
    vmem_limit = None
    if vmem_need > 12 * 1024 * 1024:
        vmem_limit = int(min(vmem_need + 8 * 1024 * 1024, 56 * 1024 * 1024))

    cost = pl.CostEstimate(
        flops=5 * n_total,
        transcendentals=2 * n_total,                  # exp + log1p per element
        bytes_accessed=n_total * (x.dtype.itemsize + target.dtype.itemsize)
        + out_bytes,
    )

    out = pl.pallas_call(
        kernel,
        out_shape=jax.ShapeDtypeStruct((out_rows, _LANES), jnp.float32),
        grid_spec=pltpu.PrefetchScalarGridSpec(
            num_scalar_prefetch=0,
            grid=(num_partitions, blocks_per_part),
            in_specs=[
                pl.BlockSpec((tile_rows, _LANES), in_map),
                pl.BlockSpec((tile_rows, _LANES), in_map),
            ],
            out_specs=pl.BlockSpec((acc_rows, _LANES), lambda p, k: (p, 0)),
        ),
        compiler_params=pltpu.CompilerParams(
            # TODO(synk): verify on v7x that "parallel" really shards the
            # partition axis across both TensorCores (else CORE_PARALLEL).
            dimension_semantics=("parallel", "arbitrary"),
            vmem_limit_bytes=vmem_limit,
        ),
        cost_estimate=cost,
    )(x2, t2)

    # Tiny final reduce (<= num_partitions * 32 * 128 f32) + mean.
    return jnp.sum(out, dtype=jnp.float32) / jnp.float32(n_total)


def _reference(x, target, smoothing):
    x = x.astype(jnp.float32)
    t = target.astype(jnp.float32)
    w = (1.0 - 2.0 * smoothing) * t
    per_elem = jnp.maximum(x, 0.0) - x * w + jnp.log1p(jnp.exp(-jnp.abs(x)))
    return jnp.mean(per_elem)


if __name__ == "__main__":
    key = jax.random.PRNGKey(0)
    kx, kt, kx2, kt2 = jax.random.split(key, 4)

    smoothing = 0.1

    # small NCHW-shaped logits and binary targets (lane-aligned size)
    x = jax.random.normal(kx, (2, 4, 16, 16), dtype=jnp.float32)
    target = (jax.random.uniform(kt, (2, 4, 16, 16)) > 0.5).astype(jnp.float32)

    loss = binary_label_smooth_loss(x, target, smoothing=smoothing)
    loss = jax.block_until_ready(loss)
    ref = _reference(x, target, smoothing)
    assert jnp.allclose(loss, ref, atol=1e-5, rtol=1e-5), (loss, ref)

    # non-lane-aligned size exercises the gated in-kernel tail masking
    x_r = jax.random.normal(kx2, (2, 3, 7, 5), dtype=jnp.float32)
    t_r = (jax.random.uniform(kt2, (2, 3, 7, 5)) > 0.5).astype(jnp.float32)

    loss_r = binary_label_smooth_loss(x_r, t_r, smoothing=smoothing)
    loss_r = jax.block_until_ready(loss_r)
    ref_r = _reference(x_r, t_r, smoothing)
    assert jnp.allclose(loss_r, ref_r, atol=1e-5, rtol=1e-5), (loss_r, ref_r)

    print("KERNEL_OK")
</pallas_src>

<mosaic_0001>
module attributes {stable_mosaic.version = 11 : i64} {
  func.func @_bls_kernel(%arg0: i32, %arg1: i32, %arg2: memref<16x128xf32, #tpu.memory_space<vmem>>, %arg3: memref<16x128xf32, #tpu.memory_space<vmem>>, %arg4: memref<8x128xf32, #tpu.memory_space<vmem>>) attributes {dimension_semantics = [#tpu.dimension_semantics<parallel>, #tpu.dimension_semantics<arbitrary>], iteration_bounds = array<i64: 1, 1>, scalar_prefetch = 0 : i64, scratch_operands = 0 : i64, tpu.core_type = #tpu.core_type<tc>, window_params = [{transform_indices = @transform_0, window_bounds = array<i64: 16, 128>}, {transform_indices = @transform_1, window_bounds = array<i64: 16, 128>}, {transform_indices = @transform_2, window_bounds = array<i64: 8, 128>}]} {
    %c0_i32 = arith.constant 0 : i32
    %0 = arith.cmpi eq, %arg1, %c0_i32 : i32
    %1 = arith.extui %0 : i1 to i32
    %c0_i32_0 = arith.constant 0 : i32
    %2 = arith.cmpi ne, %1, %c0_i32_0 : i32
    scf.if %2 {
      %cst_11 = arith.constant 0.000000e+00 : f32
      %22 = vector.broadcast %cst_11 : f32 to vector<8x128xf32>
      %c0_12 = arith.constant 0 : index
      %c0_13 = arith.constant 0 : index
      %23 = vector.load %arg4[%c0_12, %c0_13] : memref<8x128xf32, #tpu.memory_space<vmem>>, vector<8x128xf32>
      tpu.vector_store %arg4[%c0_12, %c0_13], %22 {strides = array<i32>} : memref<8x128xf32, #tpu.memory_space<vmem>>, vector<8x128xf32>,
    } else {
    }
    %c0 = arith.constant 0 : index
    %c0_1 = arith.constant 0 : index
    %3 = vector.load %arg2[%c0, %c0_1] : memref<16x128xf32, #tpu.memory_space<vmem>>, vector<16x128xf32>
    %c0_2 = arith.constant 0 : index
    %c0_3 = arith.constant 0 : index
    %4 = vector.load %arg3[%c0_2, %c0_3] : memref<16x128xf32, #tpu.memory_space<vmem>>, vector<16x128xf32>
    %cst = arith.constant 8.000000e-01 : f32
    %5 = vector.broadcast %cst : f32 to vector<16x128xf32>
    %6 = arith.mulf %5, %4 : vector<16x128xf32>
    %cst_4 = arith.constant 0.000000e+00 : f32
    %7 = vector.broadcast %cst_4 : f32 to vector<16x128xf32>
    %8 = arith.maximumf %3, %7 : vector<16x128xf32>
    %9 = arith.mulf %3, %6 : vector<16x128xf32>
    %10 = arith.subf %8, %9 : vector<16x128xf32>
    %11 = math.absf %3 : vector<16x128xf32>
    %cst_5 = arith.constant 0.000000e+00 : f32
    %12 = vector.broadcast %cst_5 : f32 to vector<16x128xf32>
    %13 = arith.subf %12, %11 : vector<16x128xf32>
    %14 = math.exp %13 : vector<16x128xf32>
    %15 = math.log1p %14 : vector<16x128xf32>
    %16 = arith.addf %10, %15 : vector<16x128xf32>
    %c0_6 = arith.constant 0 : index
    %c0_7 = arith.constant 0 : index
    %17 = vector.load %arg4[%c0_6, %c0_7] : memref<8x128xf32, #tpu.memory_space<vmem>>, vector<8x128xf32>
    %18 = vector.shape_cast %16 : vector<16x128xf32> to vector<2x8x128xf32>
    %cst_8 = arith.constant dense<0.000000e+00> : vector<8x128xf32>
    %19 = vector.multi_reduction <add>, %18, %cst_8 [0] : vector<2x8x128xf32> to vector<8x128xf32>
    %20 = arith.addf %17, %19 : vector<8x128xf32>
    %c0_9 = arith.constant 0 : index
    %c0_10 = arith.constant 0 : index
    %21 = vector.load %arg4[%c0_9, %c0_10] : memref<8x128xf32, #tpu.memory_space<vmem>>, vector<8x128xf32>
    tpu.vector_store %arg4[%c0_9, %c0_10], %20 {strides = array<i32>} : memref<8x128xf32, #tpu.memory_space<vmem>>, vector<8x128xf32>,
    return
  }
  func.func @transform_0(%arg0: i32, %arg1: i32) -> (i32, i32) {
    %c1_i32 = arith.constant 1 : i32
    %0 = arith.muli %arg0, %c1_i32 : i32
    %1 = arith.addi %0, %arg1 : i32
    %c0_i32 = arith.constant 0 : i32
    %2 = arith.minsi %1, %c0_i32 : i32
    %c0_i32_0 = arith.constant 0 : i32
    %c0_i32_1 = arith.constant 0 : i32
    return %2, %c0_i32_0 : i32, i32
  }
  func.func @transform_1(%arg0: i32, %arg1: i32) -> (i32, i32) {
    %c1_i32 = arith.constant 1 : i32
    %0 = arith.muli %arg0, %c1_i32 : i32
    %1 = arith.addi %0, %arg1 : i32
    %c0_i32 = arith.constant 0 : i32
    %2 = arith.minsi %1, %c0_i32 : i32
    %c0_i32_0 = arith.constant 0 : i32
    %c0_i32_1 = arith.constant 0 : i32
    return %2, %c0_i32_0 : i32, i32
  }
  func.func @transform_2(%arg0: i32, %arg1: i32) -> (i32, i32) {
    %c0_i32 = arith.constant 0 : i32
    %c0_i32_0 = arith.constant 0 : i32
    return %arg0, %c0_i32 : i32, i32
  }
}

</mosaic_0001>

<bundles_post_ra>
// kernel: tpu_custom_call.1
= control target key start
LH: loop header
LB: loop body
LE: loop exit
PB: predicated region body
PF: predicated region fallthrough
CT: control target
= control target key end

     0   :  { %7 = vsyncpa [#allocation3], 0  ;;  %s271_s0 = inlined_call_operand.hbm [shape: f32[16,128], index: 0, kind: input, shape index: {}]   ;;  %s272_s1 = inlined_call_operand.hbm [shape: f32[16,128], index: 1, kind: input, shape index: {}]   ;;  %s273_s2 = inlined_call_operand.hbm [shape: f32[8,128], index: 2, kind: output, shape index: {}]  }
   0x1   :  { %8 = vsyncpa [#allocation6], 0 }
   0x2   :  { %9 = vsyncpa [#allocation4], 0  ;;  %s215_s9 = smov [#allocation2]   ;;  %s143_s13 = scalar_lea.hbm %s271_s0, 256 }
   0x3   :  { %s21_s10 = sshll.u32 %s215_s9, 4  ;;  %p144_p0 = scmp.ne.s32.totalorder %s271_s0, %s143_s13  ;;  %s22_s10 = int_to_ptr.vmem [resolvable:$true] %s21_s10 }
   0x4   :  { %p147_p1 = scmp.lt.u32.totalorder %s143_s13, %s271_s0 }
   0x6   :  { %p149_p2 = pnand %p147_p1, %p144_p0 }
   0x8   :  { %152 = shalt.err (!%p149_p2)
}
   0x9   :  { %s153_s18 = scalar_lea.vmem %s22_s10, 256  ;;  %p158_p4 = scmp.lt.s32.totalorder %s22_s10, %s22_s10 }
   0xa   :  { %p154_p3 = scmp.ne.s32.totalorder %s22_s10, %s153_s18  ;;  %p159_p5 = scmp.lt.s32.totalorder %s153_s18, %s153_s18 }
   0xc   :  { %p160_p6 = por %p159_p5, %p158_p4 }
   0xe   :  { %p161_p7 = pnand %p160_p6, %p154_p3 }
  0x10   :  { %164 = shalt.err (!%p161_p7)
}
  0x11   :  { %s216_s19 = smov 128   ;;  %s217_s20 = smov 8  }
  0x12   :  { %27 = dma.hbm_to_vmem [thread:$0]  %s271_s0, 256, %s22_s10, [#allocation3], %s216_s19, %s216_s19, %s217_s20  }
  0x13   :  { %s218_s23 = smov [#allocation5]   ;;  %s165_s27 = scalar_lea.hbm %s272_s1, 256 }
  0x14   :  { %s39_s24 = sshll.u32 %s218_s23, 4  ;;  %p166_p8 = scmp.ne.s32.totalorder %s272_s1, %s165_s27  ;;  %s40_s24 = int_to_ptr.vmem [resolvable:$true] %s39_s24 }
  0x15   :  { %p169_p9 = scmp.lt.u32.totalorder %s165_s27, %s272_s1 }
  0x17   :  { %p171_p10 = pnand %p169_p9, %p166_p8 }
  0x19   :  { %174 = shalt.err (!%p171_p10)
}
  0x1a   :  { %s175_s4 = scalar_lea.vmem %s40_s24, 256  ;;  %p180_p12 = scmp.lt.s32.totalorder %s40_s24, %s40_s24 }
  0x1b   :  { %p176_p11 = scmp.ne.s32.totalorder %s40_s24, %s175_s4  ;;  %p181_p13 = scmp.lt.s32.totalorder %s175_s4, %s175_s4 }
  0x1d   :  { %p182_p0 = por %p181_p13, %p180_p12 }
  0x1f   :  { %p183_p1 = pnand %p182_p0, %p176_p11 }
  0x21   :  { %186 = shalt.err (!%p183_p1)
}
  0x22   :  { %45 = dma.hbm_to_vmem [thread:$0]  %s272_s1, 256, %s40_s24, [#allocation6], %s216_s19, %s216_s19, %s217_s20  }
  0x23   :  { %209 = dma.done.wait [#allocation3], 256  }
  0x24   :  { %210 = vsyncadd [#allocation3], 4294967040 }
  0x25   :  { %211 = dma.done.wait [#allocation6], 256  }
  0x26   :  { %212 = vsyncadd [#allocation6], 4294967040  ;;  %v65_v0 = vld [vmem:[#allocation2] sm:$0xff]  ;;  %v66_v1 = vld [vmem:[#allocation2 + $0x8] sm:$0xff]  ;;  %s219_s1 = smov [#allocation7]  }
  0x27   :  { %v77_v2 = vand.u32 2147483647, %v65_v0  ;;  %v78_v3 = vand.u32 2147483647, %v66_v1  ;;  %v67_v11 = vld [vmem:[#allocation5] sm:$0xff]  ;;  %v68_v13 = vld [vmem:[#allocation5 + $0x8] sm:$0xff] }
  0x28   :  { %v69_v15 = vmul.f32 0.8, %v67_v11  ;;  %v70_v17 = vmul.f32 0.8, %v68_v13  ;;  %v71_v19 = vmax.f32 %v65_v0, 0.0  ;;  %v72_v23 = vmax.f32 %v66_v1, 0.0 }
  0x29   :  { %v79_v4 = vsub.f32 0.0, %v77_v2  ;;  %v80_v5 = vsub.f32 0.0, %v78_v3  ;;  %s115_s6 = sshll.u32 %s219_s1, 4  ;;  %s116_s6 = int_to_ptr.vmem [resolvable:$true] %s115_s6 }
  0x2a   :  { %v73_v20 = vmul.f32 %v69_v15, %v65_v0  ;;  %v74_v24 = vmul.f32 %v70_v17, %v66_v1  ;;  %s187_s7 = scalar_lea.vmem %s116_s6, 128  ;;  %p192_p3 = scmp.lt.s32.totalorder %s116_s6, %s116_s6 }
  0x2b   :  { %v81_v6 = vmul.f32 1.442695, %v79_v4  ;;  %v83_v7 = vmul.f32 1.442695, %v80_v5  ;;  %p188_p2 = scmp.ne.s32.totalorder %s116_s6, %s187_s7  ;;  %p193_p4 = scmp.lt.s32.totalorder %s187_s7, %s187_s7 }
  0x2c   :  { %v75_v28 = vsub.f32 %v71_v19, %v73_v20  ;;  %v76_v31 = vsub.f32 %v72_v23, %v74_v24 }
  0x2d   :  { %135 = vpow2.f32 %v81_v6  ;;  %p194_p5 = por %p193_p4, %p192_p3 }
  0x2e   :  { %137 = vpow2.f32 %v83_v7 }
  0x2f   :  { %p195_p6 = pnand %p194_p5, %p188_p2 }
  0x37   :  { %v136_v8 = vpop.eup %135 }
  0x38   :  { %v138_v9 = vpop.eup %137  ;;  %v85_v10 = vadd.f32 1.0, %v136_v8  ;;  %v88_v14 = vmul.f32 -0.5, %v136_v8  ;;  %v91_v21 = vand.u32 2147483647, %v136_v8 }
  0x39   :  { %v94_v12 = vadd.f32 1.0, %v138_v9  ;;  %v97_v16 = vmul.f32 -0.5, %v138_v9  ;;  %v100_v25 = vand.u32 2147483647, %v138_v9 }
  0x3a   :  { %139 = vlog2.f32 %v85_v10  ;;  %v89_v18 = vadd.f32 1.0, %v88_v14  ;;  %vm92_vm0 = vcmp.lt.f32.partialorder %v91_v21, 0.0004427343 }
  0x3b   :  { %141 = vlog2.f32 %v94_v12  ;;  %v98_v22 = vadd.f32 1.0, %v97_v16  ;;  %vm101_vm1 = vcmp.lt.f32.partialorder %v100_v25, 0.0004427343 }
  0x3c   :  { %v90_v26 = vmul.f32 %v136_v8, %v89_v18 }
  0x3d   :  { %v99_v29 = vmul.f32 %v138_v9, %v98_v22 }
  0x44   :  { %v140_v27 = vpop.eup %139 }
  0x45   :  { %v142_v30 = vpop.eup %141  ;;  %v87_v32 = vmul.f32 0.6931472, %v140_v27 }
  0x46   :  { %v96_v33 = vmul.f32 0.6931472, %v142_v30 }
  0x47   :  { %v93_v34 = vsel %vm92_vm0, %v90_v26, %v87_v32 }
  0x48   :  { %v102_v35 = vsel %vm101_vm1, %v99_v29, %v96_v33  ;;  %v103_v36 = vadd.f32 %v93_v34, %v75_v28 }
  0x49   :  { %v104_v37 = vadd.f32 %v102_v35, %v76_v31 }
  0x4b   :  { %v106_v38 = vadd.f32 %v104_v37, %v103_v36 }
  0x4d   :  { %108 = vst [vmem:[#allocation7] sm:$0xff] %v106_v38 }
  0x4e   :  { %198 = shalt.err (!%p195_p6)
}
  0x4f   :  { %s199_s10 = scalar_lea.hbm %s273_s2, 128 }
  0x50   :  { %p200_p7 = scmp.ne.s32.totalorder %s273_s2, %s199_s10  ;;  %p203_p8 = scmp.lt.u32.totalorder %s199_s10, %s273_s2 }
  0x52   :  { %p205_p9 = pnand %p203_p8, %p200_p7 }
  0x54   :  { %208 = shalt.err (!%p205_p9)
}
  0x55   :  { %118 = dma.vmem_to_hbm [thread:$0]  %s116_s6, 128, %s273_s2, [#allocation4]  }
  0x56   :  { %213 = dma.done.wait [#allocation4], 128  }
  0x57   :  { %214 = vsyncadd [#allocation4], 4294967168 }
  0x58   :  { %122 = vsyncpa [#allocation3], 1 }
  0x59   :  { %123 = vsyncpa [#allocation6], 1 }
  0x5a   :  { %124 = vsyncpa [#allocation4], 1 }

</bundles_post_ra>
